<compile_context>
chip_gen: v5e
topology: v5e:2x2
jax: 0.10.0
libtpu: 0.0.40
codegen_flags: <defaults>
</compile_context>

<pallas_src>
import functools

import jax
import jax.numpy as jnp
from jax import lax
from jax.experimental import pallas as pl
from jax.experimental.pallas import tpu as pltpu


def _round_up(x, m):
    return ((x + m - 1) // m) * m


def _edge_plane(x, above, below, zero_col):
    """Edge magnitude for one (R, W) tile.

    x: (R, W) in the compute dtype.  above / below: (1, W) rows just outside the tile
    (already zeroed when the tile touches the image border).  zero_col: (R, 1) zeros.
    Zero-edge concatenations implement the conv's zero padding directly -- no iota masks.
    """
    up = jnp.concatenate([above, x[:-1, :]], axis=0)      # x[i-1, j]
    dn = jnp.concatenate([x[1:, :], below], axis=0)       # x[i+1, j]
    lt = jnp.concatenate([zero_col, x[:, :-1]], axis=1)   # x[i, j-1]
    rt = jnp.concatenate([x[:, 1:], zero_col], axis=1)    # x[i, j+1]
    v = (dn - up).astype(jnp.float32)
    h = (rt - lt).astype(jnp.float32)
    return jnp.sqrt(v * v + h * h + 1e-6)                 # eps + sqrt always in f32


def _edge_kernel_full(x_ref, o_ref, *, compute_dtype):
    # One batch element per grid step; block is (1, 3, H, W).  All image-boundary
    # neighbours are zero (conv padding=1).
    R, W = x_ref.shape[-2], x_ref.shape[-1]
    zero_row = jnp.zeros((1, W), compute_dtype)            # hoisted out of the channel loop
    zero_col = jnp.zeros((R, 1), compute_dtype)
    for c in range(3):                                     # static unroll over 3 channels
        x = x_ref[0, c].astype(compute_dtype)
        o_ref[0, c] = _edge_plane(x, zero_row, zero_row, zero_col).astype(o_ref.dtype)


def _edge_kernel_tiled(x_ref, xa_ref, xb_ref, o_ref, *, compute_dtype):
    # Row-tiled step: x_ref is (1, 3, TH, W).  xa_ref / xb_ref are 8-row blocks containing
    # the halo rows just above / below this tile (block indices clamped at the image
    # borders, where the halo rows are zeroed instead).
    t = pl.program_id(1)
    first = t == 0
    last = t == pl.num_programs(1) - 1
    R, W = x_ref.shape[-2], x_ref.shape[-1]
    zero_col = jnp.zeros((R, 1), compute_dtype)            # hoisted out of the channel loop
    for c in range(3):                                     # static unroll over 3 channels
        x = x_ref[0, c].astype(compute_dtype)
        above = xa_ref[0, c][7:8, :]                       # last row of the block above
        below = xb_ref[0, c][0:1, :]                       # first row of the block below
        above = jnp.where(first, 0, above).astype(compute_dtype)
        below = jnp.where(last, 0, below).astype(compute_dtype)
        o_ref[0, c] = _edge_plane(x, above, below, zero_col).astype(o_ref.dtype)


def _vmem_budget():
    """(tile_budget_bytes, vmem_limit_bytes) sized per TPU generation.

    ~3/8 of physical VMEM for the double-buffered tiles and ~3/4 for the scoped limit:
    v5e/v6e (128 MiB) -> ~48 / 96 MiB; v7x (64 MiB per core) -> ~24 / 48 MiB.
    Falls back to v7x-safe values if the query is unavailable.
    """
    cap = None
    try:
        cap = int(pltpu.get_tpu_info().vmem_capacity_bytes)
    except Exception:
        cap = None
    if not cap or cap <= 0:
        cap = 64 * 1024 * 1024
    tile_budget = (cap * 3) // 8
    vmem_limit = min((cap * 3) // 4, 100 * 1024 * 1024)
    return tile_budget, vmem_limit


def _pick_row_tile(H, W, itemsize, budget, min_tiles):
    """Largest multiple-of-8 divisor of H whose double-buffered in+out tiles (plus the two
    8-row halo blocks when tiled) fit `budget`, honoring a minimum tile count (>= 2 when
    N == 1 so v7x's two cores both get parallel grid steps)."""
    if H % 8 != 0:
        return H                                   # wrapper pads H, so this is a fallback
    per_row = 12 * W * itemsize                    # 2 bufs x (in + out) x 3 channels
    halo = 96 * W * itemsize                       # 2 halo specs x 2 bufs x 3 ch x 8 rows
    candidates = [th for th in range(8, H + 1, 8) if H % th == 0]
    feasible = [th for th in candidates
                if (H // th) >= min_tiles
                and th * per_row + (0 if th == H else halo) <= budget]
    if feasible:
        return max(feasible)
    honoring = [th for th in candidates if (H // th) >= min_tiles]
    return min(honoring) if honoring else min(candidates)


def find_3channel_edge_coarse_edge(x, *, row_tile=None, bf16_compute=False):
    """Pallas TPU forward of ISNet's Find3ChannelEdgeCoarseEdge.

    x: (N, C, H, W), C >= 3.  Returns (N, 3, H, W) with the same dtype as x.
    """
    N, C, H, W = x.shape
    assert C >= 3, "module reads channels 0, 1, 2"
    dtype = x.dtype
    itemsize = jnp.dtype(dtype).itemsize
    compute_dtype = (jnp.bfloat16 if (bf16_compute and dtype == jnp.bfloat16)
                     else jnp.float32)

    # Pad to TPU-native alignment only when needed: W -> multiple of 128 (lane-dense,
    # unmasked stores; roll-free aligned tiles), H -> multiple of 8 (row-tilable).  Zero
    # padding matches the conv's zero padding, and the pad region is sliced off afterwards.
    Hp, Wp = _round_up(H, 8), _round_up(W, 128)
    padded = (Hp, Wp) != (H, W)
    if padded:
        # We're copying anyway; fold the C>3 channel selection into the same pad copy.
        src = x[:, :3] if C > 3 else x
        xin = jnp.pad(src, ((0, 0), (0, 0), (0, Hp - H), (0, Wp - W)))
    else:
        # No copy: the channel-axis BlockSpec (block 3, index 0) reads channels 0..2
        # directly from the C-channel input.
        xin = x

    budget, vmem_limit = _vmem_budget()
    min_tiles = 2 if N == 1 else 1      # keep >= 2 parallel grid steps for v7x megacore
    TH = (_pick_row_tile(Hp, Wp, itemsize, budget, min_tiles)
          if row_tile is None else row_tile)
    if TH != Hp:
        assert Hp % TH == 0 and TH % 8 == 0, \
            "row tile must be a multiple-of-8 divisor of the (padded) height"

    out_shape = jax.ShapeDtypeStruct((N, 3, Hp, Wp), dtype)

    if TH == Hp:
        # Whole image (all 3 channels fused) per grid step.
        out = pl.pallas_call(
            functools.partial(_edge_kernel_full, compute_dtype=compute_dtype),
            out_shape=out_shape,
            grid=(N,),
            in_specs=[pl.BlockSpec((1, 3, Hp, Wp), lambda n: (n, 0, 0, 0))],
            out_specs=pl.BlockSpec((1, 3, Hp, Wp), lambda n: (n, 0, 0, 0)),
            compiler_params=pltpu.CompilerParams(
                dimension_semantics=("parallel",),
                vmem_limit_bytes=vmem_limit),
        )(xin)
    else:
        # Row-tiled path: (1, 3, TH, Wp) tiles plus two 8-row halo blocks of the same
        # input (block indices clamped at the image borders; those rows are zeroed
        # in-kernel).  The same array is passed once per BlockSpec.
        nt = Hp // TH
        bpr = TH // 8        # 8-row blocks per row tile
        h8 = Hp // 8         # 8-row blocks per image
        out = pl.pallas_call(
            functools.partial(_edge_kernel_tiled, compute_dtype=compute_dtype),
            out_shape=out_shape,
            grid=(N, nt),
            in_specs=[
                pl.BlockSpec((1, 3, TH, Wp), lambda n, t: (n, 0, t, 0)),
                pl.BlockSpec((1, 3, 8, Wp),
                             lambda n, t: (n, 0, jnp.maximum(t * bpr - 1, 0), 0)),
                pl.BlockSpec((1, 3, 8, Wp),
                             lambda n, t: (n, 0, jnp.minimum((t + 1) * bpr, h8 - 1), 0)),
            ],
            out_specs=pl.BlockSpec((1, 3, TH, Wp), lambda n, t: (n, 0, t, 0)),
            compiler_params=pltpu.CompilerParams(
                dimension_semantics=("parallel", "parallel"),
                vmem_limit_bytes=vmem_limit),
        )(xin, xin, xin)

    if padded:
        out = out[:, :, :H, :W]
    return out


def _reference(x):
    """Pure-JAX reference using real convolutions (matches the PyTorch module)."""
    kernel_v = jnp.array([[0, -1, 0], [0, 0, 0], [0, 1, 0]], jnp.float32)
    kernel_h = jnp.array([[0, 0, 0], [-1, 0, 1], [0, 0, 0]], jnp.float32)
    kv = kernel_v[None, None]   # (1,1,3,3) OIHW
    kh = kernel_h[None, None]

    def conv(plane, w):   # plane: (N, 1, H, W)
        return lax.conv_general_dilated(
            plane, w, window_strides=(1, 1), padding=((1, 1), (1, 1)),
            dimension_numbers=("NCHW", "OIHW", "NCHW"))

    outs = []
    for c in range(3):
        p = x[:, c:c + 1].astype(jnp.float32)
        v = conv(p, kv)
        h = conv(p, kh)
        outs.append(jnp.sqrt(v * v + h * h + 1e-6))
    return jnp.concatenate(outs, axis=1)


if __name__ == "__main__":
    key = jax.random.PRNGKey(0)
    k1, k2, k3 = jax.random.split(key, 3)

    # 1) Module-sized check (C=4, W padded to 128, full-height path).
    x = jax.random.normal(k1, (2, 4, 16, 16), dtype=jnp.float32)
    out = jax.block_until_ready(find_3channel_edge_coarse_edge(x))
    ref = jax.block_until_ready(_reference(x))
    assert out.shape == (2, 3, 16, 16)
    assert jnp.allclose(out, ref, atol=1e-5, rtol=1e-5), "mismatch (full path)"

    # 2) Row-tiled halo path (3 row tiles, incl. an interior tile fed by both halos).
    x2 = jax.random.normal(k2, (1, 3, 48, 96), dtype=jnp.float32)
    out2 = jax.block_until_ready(find_3channel_edge_coarse_edge(x2, row_tile=16))
    ref2 = jax.block_until_ready(_reference(x2))
    assert jnp.allclose(out2, ref2, atol=1e-5, rtol=1e-5), "mismatch (tiled path)"

    # 3) Auto tile choice: N == 1 forces >= 2 row tiles; W=160 exercises wrapper padding.
    x3 = jax.random.normal(k3, (1, 3, 32, 160), dtype=jnp.float32)
    out3 = jax.block_until_ready(find_3channel_edge_coarse_edge(x3))
    ref3 = jax.block_until_ready(_reference(x3))
    assert out3.shape == (1, 3, 32, 160)
    assert jnp.allclose(out3, ref3, atol=1e-5, rtol=1e-5), "mismatch (auto-tiled path)"

    print("KERNEL_OK")
</pallas_src>

<mosaic_0001>
module attributes {stable_mosaic.version = 11 : i64} {
  func.func @_edge_kernel_full(%arg0: i32, %arg1: memref<1x3x16x128xf32, #tpu.memory_space<vmem>>, %arg2: memref<1x3x16x128xf32, #tpu.memory_space<vmem>>) attributes {dimension_semantics = [#tpu.dimension_semantics<parallel>], iteration_bounds = array<i64: 2>, scalar_prefetch = 0 : i64, scratch_operands = 0 : i64, tpu.core_type = #tpu.core_type<tc>, window_params = [{transform_indices = @transform_0, window_bounds = array<i64: 1, 3, 16, 128>}, {transform_indices = @transform_1, window_bounds = array<i64: 1, 3, 16, 128>}]} {
    %cst = arith.constant 0.000000e+00 : f32
    %0 = vector.broadcast %cst : f32 to vector<1x128xf32>
    %cst_0 = arith.constant 0.000000e+00 : f32
    %1 = vector.broadcast %cst_0 : f32 to vector<16x1xf32>
    %c0 = arith.constant 0 : index
    %c0_1 = arith.constant 0 : index
    %c0_2 = arith.constant 0 : index
    %c0_3 = arith.constant 0 : index
    %2 = vector.load %arg1[%c0, %c0_1, %c0_2, %c0_3] : memref<1x3x16x128xf32, #tpu.memory_space<vmem>>, vector<1x1x16x128xf32>
    %3 = vector.shape_cast %2 : vector<1x1x16x128xf32> to vector<16x128xf32>
    %4 = vector.extract_strided_slice %3 {offsets = [0, 0], sizes = [15, 128], strides = [1, 1]} : vector<16x128xf32> to vector<15x128xf32>
    %5 = tpu.concatenate %0, %4 in 0 : vector<1x128xf32>, vector<15x128xf32> -> vector<16x128xf32>
    %6 = vector.extract_strided_slice %3 {offsets = [1, 0], sizes = [15, 128], strides = [1, 1]} : vector<16x128xf32> to vector<15x128xf32>
    %7 = tpu.concatenate %6, %0 in 0 : vector<15x128xf32>, vector<1x128xf32> -> vector<16x128xf32>
    %8 = vector.extract_strided_slice %3 {offsets = [0, 0], sizes = [16, 127], strides = [1, 1]} : vector<16x128xf32> to vector<16x127xf32>
    %9 = tpu.concatenate %1, %8 in 1 : vector<16x1xf32>, vector<16x127xf32> -> vector<16x128xf32>
    %10 = vector.extract_strided_slice %3 {offsets = [0, 1], sizes = [16, 127], strides = [1, 1]} : vector<16x128xf32> to vector<16x127xf32>
    %11 = tpu.concatenate %10, %1 in 1 : vector<16x127xf32>, vector<16x1xf32> -> vector<16x128xf32>
    %12 = arith.subf %7, %5 : vector<16x128xf32>
    %13 = arith.subf %11, %9 : vector<16x128xf32>
    %14 = arith.mulf %12, %12 : vector<16x128xf32>
    %15 = arith.mulf %13, %13 : vector<16x128xf32>
    %16 = arith.addf %14, %15 : vector<16x128xf32>
    %cst_4 = arith.constant 9.99999997E-7 : f32
    %17 = vector.broadcast %cst_4 : f32 to vector<16x128xf32>
    %18 = arith.addf %16, %17 : vector<16x128xf32>
    %19 = math.sqrt %18 : vector<16x128xf32>
    %c0_5 = arith.constant 0 : index
    %c0_6 = arith.constant 0 : index
    %c0_7 = arith.constant 0 : index
    %c0_8 = arith.constant 0 : index
    %20 = vector.load %arg2[%c0_5, %c0_6, %c0_7, %c0_8] : memref<1x3x16x128xf32, #tpu.memory_space<vmem>>, vector<1x1x16x128xf32>
    %21 = vector.shape_cast %20 : vector<1x1x16x128xf32> to vector<16x128xf32>
    %22 = vector.shape_cast %19 : vector<16x128xf32> to vector<1x1x16x128xf32>
    tpu.vector_store %arg2[%c0_5, %c0_6, %c0_7, %c0_8], %22 {strides = array<i32>} : memref<1x3x16x128xf32, #tpu.memory_space<vmem>>, vector<1x1x16x128xf32>,
    %c0_9 = arith.constant 0 : index
    %c1 = arith.constant 1 : index
    %c0_10 = arith.constant 0 : index
    %c0_11 = arith.constant 0 : index
    %23 = vector.load %arg1[%c0_9, %c1, %c0_10, %c0_11] : memref<1x3x16x128xf32, #tpu.memory_space<vmem>>, vector<1x1x16x128xf32>
    %24 = vector.shape_cast %23 : vector<1x1x16x128xf32> to vector<16x128xf32>
    %25 = vector.extract_strided_slice %24 {offsets = [0, 0], sizes = [15, 128], strides = [1, 1]} : vector<16x128xf32> to vector<15x128xf32>
    %26 = tpu.concatenate %0, %25 in 0 : vector<1x128xf32>, vector<15x128xf32> -> vector<16x128xf32>
    %27 = vector.extract_strided_slice %24 {offsets = [1, 0], sizes = [15, 128], strides = [1, 1]} : vector<16x128xf32> to vector<15x128xf32>
    %28 = tpu.concatenate %27, %0 in 0 : vector<15x128xf32>, vector<1x128xf32> -> vector<16x128xf32>
    %29 = vector.extract_strided_slice %24 {offsets = [0, 0], sizes = [16, 127], strides = [1, 1]} : vector<16x128xf32> to vector<16x127xf32>
    %30 = tpu.concatenate %1, %29 in 1 : vector<16x1xf32>, vector<16x127xf32> -> vector<16x128xf32>
    %31 = vector.extract_strided_slice %24 {offsets = [0, 1], sizes = [16, 127], strides = [1, 1]} : vector<16x128xf32> to vector<16x127xf32>
    %32 = tpu.concatenate %31, %1 in 1 : vector<16x127xf32>, vector<16x1xf32> -> vector<16x128xf32>
    %33 = arith.subf %28, %26 : vector<16x128xf32>
    %34 = arith.subf %32, %30 : vector<16x128xf32>
    %35 = arith.mulf %33, %33 : vector<16x128xf32>
    %36 = arith.mulf %34, %34 : vector<16x128xf32>
    %37 = arith.addf %35, %36 : vector<16x128xf32>
    %cst_12 = arith.constant 9.99999997E-7 : f32
    %38 = vector.broadcast %cst_12 : f32 to vector<16x128xf32>
    %39 = arith.addf %37, %38 : vector<16x128xf32>
    %40 = math.sqrt %39 : vector<16x128xf32>
    %c0_13 = arith.constant 0 : index
    %c1_14 = arith.constant 1 : index
    %c0_15 = arith.constant 0 : index
    %c0_16 = arith.constant 0 : index
    %41 = vector.load %arg2[%c0_13, %c1_14, %c0_15, %c0_16] : memref<1x3x16x128xf32, #tpu.memory_space<vmem>>, vector<1x1x16x128xf32>
    %42 = vector.shape_cast %41 : vector<1x1x16x128xf32> to vector<16x128xf32>
    %43 = vector.shape_cast %40 : vector<16x128xf32> to vector<1x1x16x128xf32>
    tpu.vector_store %arg2[%c0_13, %c1_14, %c0_15, %c0_16], %43 {strides = array<i32>} : memref<1x3x16x128xf32, #tpu.memory_space<vmem>>, vector<1x1x16x128xf32>,
    %c0_17 = arith.constant 0 : index
    %c2 = arith.constant 2 : index
    %c0_18 = arith.constant 0 : index
    %c0_19 = arith.constant 0 : index
    %44 = vector.load %arg1[%c0_17, %c2, %c0_18, %c0_19] : memref<1x3x16x128xf32, #tpu.memory_space<vmem>>, vector<1x1x16x128xf32>
    %45 = vector.shape_cast %44 : vector<1x1x16x128xf32> to vector<16x128xf32>
    %46 = vector.extract_strided_slice %45 {offsets = [0, 0], sizes = [15, 128], strides = [1, 1]} : vector<16x128xf32> to vector<15x128xf32>
    %47 = tpu.concatenate %0, %46 in 0 : vector<1x128xf32>, vector<15x128xf32> -> vector<16x128xf32>
    %48 = vector.extract_strided_slice %45 {offsets = [1, 0], sizes = [15, 128], strides = [1, 1]} : vector<16x128xf32> to vector<15x128xf32>
    %49 = tpu.concatenate %48, %0 in 0 : vector<15x128xf32>, vector<1x128xf32> -> vector<16x128xf32>
    %50 = vector.extract_strided_slice %45 {offsets = [0, 0], sizes = [16, 127], strides = [1, 1]} : vector<16x128xf32> to vector<16x127xf32>
    %51 = tpu.concatenate %1, %50 in 1 : vector<16x1xf32>, vector<16x127xf32> -> vector<16x128xf32>
    %52 = vector.extract_strided_slice %45 {offsets = [0, 1], sizes = [16, 127], strides = [1, 1]} : vector<16x128xf32> to vector<16x127xf32>
    %53 = tpu.concatenate %52, %1 in 1 : vector<16x127xf32>, vector<16x1xf32> -> vector<16x128xf32>
    %54 = arith.subf %49, %47 : vector<16x128xf32>
    %55 = arith.subf %53, %51 : vector<16x128xf32>
    %56 = arith.mulf %54, %54 : vector<16x128xf32>
    %57 = arith.mulf %55, %55 : vector<16x128xf32>
    %58 = arith.addf %56, %57 : vector<16x128xf32>
    %cst_20 = arith.constant 9.99999997E-7 : f32
    %59 = vector.broadcast %cst_20 : f32 to vector<16x128xf32>
    %60 = arith.addf %58, %59 : vector<16x128xf32>
    %61 = math.sqrt %60 : vector<16x128xf32>
    %c0_21 = arith.constant 0 : index
    %c2_22 = arith.constant 2 : index
    %c0_23 = arith.constant 0 : index
    %c0_24 = arith.constant 0 : index
    %62 = vector.load %arg2[%c0_21, %c2_22, %c0_23, %c0_24] : memref<1x3x16x128xf32, #tpu.memory_space<vmem>>, vector<1x1x16x128xf32>
    %63 = vector.shape_cast %62 : vector<1x1x16x128xf32> to vector<16x128xf32>
    %64 = vector.shape_cast %61 : vector<16x128xf32> to vector<1x1x16x128xf32>
    tpu.vector_store %arg2[%c0_21, %c2_22, %c0_23, %c0_24], %64 {strides = array<i32>} : memref<1x3x16x128xf32, #tpu.memory_space<vmem>>, vector<1x1x16x128xf32>,
    return
  }
  func.func @transform_0(%arg0: i32) -> (i32, i32, i32, i32) {
    %c0_i32 = arith.constant 0 : i32
    %c0_i32_0 = arith.constant 0 : i32
    %c0_i32_1 = arith.constant 0 : i32
    %c0_i32_2 = arith.constant 0 : i32
    return %arg0, %c0_i32, %c0_i32_0, %c0_i32_1 : i32, i32, i32, i32
  }
  func.func @transform_1(%arg0: i32) -> (i32, i32, i32, i32) {
    %c0_i32 = arith.constant 0 : i32
    %c0_i32_0 = arith.constant 0 : i32
    %c0_i32_1 = arith.constant 0 : i32
    %c0_i32_2 = arith.constant 0 : i32
    return %arg0, %c0_i32, %c0_i32_0, %c0_i32_1 : i32, i32, i32, i32
  }
}

</mosaic_0001>

<bundles_post_ra>
// kernel: tpu_custom_call.1
= control target key start
LH: loop header
LB: loop body
LE: loop exit
PB: predicated region body
PF: predicated region fallthrough
CT: control target
= control target key end

     0   :  { %6 = vsyncpa [#allocation3], 0  ;;  %s836_s0 = inlined_call_operand.hbm [shape: f32[2,3,16,128], index: 0, kind: input, shape index: {}]   ;;  %s837_s1 = inlined_call_operand.hbm [shape: f32[2,3,16,128], index: 1, kind: output, shape index: {}]  }
   0x1   :  { %8 = vsyncpa [#allocation3 + $0x1], 0 }
   0x2   :  { %9 = vsyncpa [#allocation4], 0 }
   0x3   :  { %11 = vsyncpa [#allocation4 + $0x1], 0  ;;  %s642_s6 = smov 0   ;;  %s644_s7 = smov 0  }
   0x4   :  { %s646_s8 = smov 0   ;;  %s648_s9 = smov 0  }
   0x5 LB: > { %s663_s10 = sadd.s32 4294967295, %s624_s9   ;;  %s444_s11 = sadd.s32 4294967294, %s624_s9   ;;  %s624_s9 = sphi %s648_s9, %s845_s9   ;;  %s620_s8 = sphi %s646_s8, %s844_s8   ;;  %s616_s7 = sphi %s644_s7, %s843_s7   ;;  %s612_s6 = sphi %s642_s6, %s842_s6  }
   0x6   : > { %s667_s12 = sadd.s32 1, %s624_s9   ;;  %s24_s13 = sadd.s32 1, %s620_s8 }
   0x7   : > { %s21_s14 = ssub.s32 %s624_s9, %s667_s12  ;;  %p31_p0 = scmp.ne.s32.totalorder %s620_s8, %s616_s7 }
   0x8   : > { %p22_p1 = scmp.eq.s32.totalorder %s21_s14, 0  ;;  %p32_p2 = scmp.eq.s32.totalorder %s624_s9, 0 }
   0x9   : > { %p37_p3 = scmp.ne.s32.totalorder %s616_s7, %s612_s6  ;;  %p38_p4 = scmp.eq.s32.totalorder %s663_s10, 0 }
   0xa   : > { %s679_s15 = scalar_select %p22_p1, %s620_s8, %s24_s13  }
   0xb   : > { %p33_p5 = por %p32_p2, %p31_p0  ;;  %p681_p6 = por %p38_p4, %p37_p3 }
   0xc   : > { %p61_p7 = scmp.eq.s32.totalorder %s663_s10, 1  ;;  %p67_p8 = scmp.eq.s32.totalorder %s444_s11, 1 }
   0xd   : > { %p446_p9 = scmp.ge.s32.totalorder %s624_s9, 2  ;;  %p476_p10 = scmp.lt.s32.totalorder %s624_s9, 2 }
   0xe   : > { %p688_p11 = por %p61_p7, %p31_p0  ;;  %p692_p12 = por %p67_p8, %p37_p3 }
   0xf   : > { %s87_s19 = sand.u32 1, %s620_s8   ;;  %s461_s20 = smul.u32 48, %s624_s9 }
  0x10   : > { %s460_s21 = smul.u32 48, %s87_s19  ;;  %p701_p13 = pnand %p476_p10, %p33_p5 }
  0x11   : > { %s96_s24 = scalar_lea.hbm %s836_s0, %s461_s20  ;;  %s88_s29 = scalar_lea.sflag [#allocation3], %s87_s19 }
  0x12   : > { %s97_s26 = sshll.u32 %s96_s24, 4  ;;  %s91_s27 = scalar_lea.vmem [#allocation2], %s460_s21  ;;  %s98_s26 = int_to_ptr.hbm [resolvable:$true] %s97_s26 }
  0x13   : > { %s99_s28 = sshll.u32 %s91_s27, 4  ;;  %s528_s30 = sshra.s32 %s98_s26, 4  ;;  %s100_s28 = int_to_ptr.vmem [resolvable:$true] %s99_s28  ;;  %s529_s30 = int_to_ptr.hbm [resolvable:$true] %s528_s30 }
  0x14   : > { %s530_s2 = scalar_lea.hbm %s529_s30, 48  ;;  %p532_p1 = pneg %p701_p13 }
  0x15   : > { %p531_p0 = scmp.ne.s32.totalorder %s529_s30, %s530_s2  ;;  %s535_s5 = scalar_lea.hbm %s836_s0, 96 }
  0x16   : > { %p536_p4 = scmp.lt.s32.totalorder %s529_s30, %s836_s0  ;;  %p537_p5 = scmp.lt.s32.totalorder %s535_s5, %s530_s2 }
  0x17   : > { %p533_p2 = pnand %p532_p1, %p531_p0 }
  0x18   : > { %p538_p7 = por %p537_p5, %p536_p4 }
  0x19   : > { %p534_p3 = pneg %p533_p2 }
  0x1b   : > { %p539_p8 = pnand %p538_p7, %p534_p3 }
  0x1d   : > { %542 = shalt.err (!%p539_p8)
}
  0x1e   : > { %s626_s14 = smov 128   ;;  %s627_s19 = smov 8  }
  0x1f   : > { %471 = dma.hbm_to_vmem [thread:$0]  (!%p701_p13), %s98_s26, 768, %s100_s28, %s88_s29, %s626_s14, %s626_s14, %s627_s19  }
  0x20   : > { %p448_p10 = scmp.ge.s32.totalorder %s624_s9, 1  ;;  %p107_p0 = scmp.lt.s32.totalorder %s624_s9, 3 }
  0x22   : > { %p108_p1 = pnand %p448_p10, %p107_p0 }
  0x23   : > { %s718_s20 = sand.u32 (!%p108_p1), 1, %s616_s7  }
  0x24   : > { %111 = sbr.rel (%p108_p1) target bundleno = 217 (0xd9), region = 24  ;;  %s114_s22 = scalar_lea.sflag (!%p108_p1), [#allocation3], %s718_s20 }
  0x25   : > { %s462_s21 = smul.u32 (!%p108_p1), 48, %s718_s20 }
  0x27   : > { %s117_s23 = scalar_lea.vmem (!%p108_p1), [#allocation2], %s462_s21 }
  0x29   : > { %603 = dma.done.wait (%p681_p6), %s114_s22, 768  }
  0x2a   : > { %605 = vsyncadd (%p681_p6), %s114_s22, 4294966528  ;;  %v137_v0 = vld [vmem:[%s117_s23] sm:$0xff]  ;;  %s628_s24 = smov 127   ;;  %s629_s25 = smov 1   ;;  %v449_v1 = vld [vmem:[%s117_s23 + $0x10] sm:$0xff]  ;;  %vm141_vm0 = vcmask 1040384  }
  0x2b   : > { %164 = vrot.lane.b32.xlu1 %v137_v0, %s628_s24  ;;  %155 = vrot.lane.b32.xlu0 %v137_v0, %s629_s25  ;;  %v138_v2 = vld [vmem:[%s117_s23 + $0x8] sm:$0xff]  ;;  %v450_v3 = vld [vmem:[%s117_s23 + $0x18] sm:$0xff]  ;;  %v142_v6 = vrot.slane %v137_v0, 7  ;;  %v149_v7 = vrot.slane %v137_v0, 1  ;;  %vm148_vm1 = vcmask 1046528   ;;  %v216_v18 = vrot.slane %v449_v1, 7 }
  0x2c   : > { %228 = vrot.lane.b32.xlu2 %v449_v1, %s629_s25  ;;  %v453_v4 = vld [vmem:[%s117_s23 + $0x20] sm:$0xff]  ;;  %v454_v5 = vld [vmem:[%s117_s23 + $0x28] sm:$0xff]  ;;  %v150_v8 = vrot.slane %v138_v2, 1  ;;  %v143_v12 = vrot.slane %v138_v2, 7  ;;  %v217_v16 = vrot.slane %v450_v3, 7  ;;  %v223_v17 = vrot.slane %v450_v3, 1 }
  0x2d   : > { %v147_v9 = vsel %vm141_vm0, 0.0, %v142_v6  ;;  %v222_v19 = vrot.slane %v449_v1, 1  ;;  %v221_v22 = vsel %vm141_vm0, 0.0, %v216_v18  ;;  %v288_v26 = vrot.slane %v453_v4, 7  ;;  %s768_s16 = scalar_lea.vmem [#allocation5], %s462_s21  ;;  %s463_s26 = smul.u32 48, %s663_s10 }
  0x2e   : > { %v151_v10 = vsel %vm148_vm1, %v149_v7, %v150_v8  ;;  %v154_v13 = vsel %vm148_vm1, %v150_v8, 0.0  ;;  %v144_v14 = vsel %vm141_vm0, %v142_v6, %v143_v12  ;;  %v218_v20 = vsel %vm141_vm0, %v216_v18, %v217_v16  ;;  %s368_s10 = sshll.u32 %s768_s16, 4  ;;  %s356_s2 = scalar_lea.sflag [#allocation4], %s718_s20  ;;  %s369_s10 = int_to_ptr.vmem [resolvable:$true] %s368_s10 }
  0x2f   : > { %v173_v11 = vsub.f32 %v151_v10, %v147_v9  ;;  %v174_v15 = vsub.f32 %v154_v13, %v144_v14  ;;  %v227_v21 = vsel %vm148_vm1, %v223_v17, 0.0  ;;  %v224_v23 = vsel %vm148_vm1, %v222_v19, %v223_v17  ;;  %s367_s29 = scalar_lea.hbm %s837_s1, %s463_s26  ;;  %s578_s13 = scalar_lea.hbm %s837_s1, 96 }
  0x30   : > { %v245_v24 = vsub.f32 %v227_v21, %v218_v20  ;;  %v244_v25 = vsub.f32 %v224_v23, %v221_v22  ;;  %v294_v27 = vrot.slane %v453_v4, 1  ;;  %v295_v28 = vrot.slane %v454_v5, 1  ;;  %s370_s30 = sshll.u32 %s367_s29, 4  ;;  %s371_s30 = int_to_ptr.hbm [resolvable:$true] %s370_s30 }
  0x31   : > { %v289_v29 = vrot.slane %v454_v5, 7  ;;  %v293_v31 = vsel %vm141_vm0, 0.0, %v288_v26  ;;  %vm161_vm2 = vcmask 7168   ;;  %vm170_vm3 = vcmask 1039360   ;;  %s572_s3 = sshra.s32 %s371_s30, 4  ;;  %s573_s3 = int_to_ptr.hbm [resolvable:$true] %s572_s3 }
  0x32   : > { %v296_v32 = vsel %vm148_vm1, %v294_v27, %v295_v28  ;;  %v299_v35 = vsel %vm148_vm1, %v295_v28, 0.0  ;;  %v177_v42 = vmul.f32 %v173_v11, %v173_v11  ;;  %v178_v52 = vmul.f32 %v174_v15, %v174_v15  ;;  %s574_s4 = scalar_lea.hbm %s573_s3, 48  ;;  %p579_p3 = scmp.lt.s32.totalorder %s573_s3, %s837_s1 }
  0x33   : > { %166 = vrot.lane.b32.xlu1 %v138_v2, %s628_s24  ;;  %157 = vrot.lane.b32.xlu0 %v138_v2, %s629_s25  ;;  %v316_v33 = vsub.f32 %v296_v32, %v293_v31  ;;  %v290_v34 = vsel %vm141_vm0, %v288_v26, %v289_v29  ;;  %p575_p6 = scmp.ne.s32.totalorder %s573_s3, %s574_s4  ;;  %p580_p4 = scmp.lt.s32.totalorder %s578_s13, %s574_s4 }
  0x34   : > { %230 = vrot.lane.b32.xlu2 %v450_v3, %s629_s25  ;;  %v740_v36 = vsub.f32 %v299_v35, %v290_v34 }
  0x35   : > { %p576_p13 = pnand %p575_p6, %p688_p11  ;;  %p581_p5 = por %p580_p4, %p579_p3 }
  0x37   : > { %p577_p2 = pneg %p576_p13 }
  0x39   : > { %p582_p7 = pnand %p581_p5, %p577_p2 }
  0x3b   : > { %238 = vrot.lane.b32.xlu1 %v450_v3, %s628_s24  ;;  %236 = vrot.lane.b32.xlu0 %v449_v1, %s628_s24  ;;  %v249_v1 = vmul.f32 %v245_v24, %v245_v24  ;;  %v248_v3 = vmul.f32 %v244_v25, %v244_v25  ;;  %v320_v25 = vmul.f32 %v316_v33, %v316_v33 }
  0x3c   : > { %300 = vrot.lane.b32.xlu2 %v453_v4, %s629_s25 }
  0x43   : > { %308 = vrot.lane.b32.xlu1 %v453_v4, %s628_s24  ;;  %302 = vrot.lane.b32.xlu0 %v454_v5, %s629_s25 }
  0x44   : > { %310 = vrot.lane.b32.xlu2 %v454_v5, %s628_s24 }
  0x86   : > { %v229_v30 = vpop.permute.xlu2 %228 }
  0x87   : > { %v234_v57 = vsel %vm161_vm2, 0.0, %v229_v30  ;;  %v321_v30 = vmul.f32 %v740_v36, %v740_v36 }
  0x8e   : > { %v231_v43 = vpop.permute.xlu2 %230 }
  0x8f   : > { %v235_v58 = vsel %vm161_vm2, 0.0, %v231_v43 }
  0x96   : > { %v301_v54 = vpop.permute.xlu2 %300 }
  0x97   : > { %v306_v24 = vsel %vm161_vm2, 0.0, %v301_v54 }
  0x9d   : > { %v165_v37 = vpop.permute.xlu1 %164  ;;  %v156_v38 = vpop.permute.xlu0 %155 }
  0x9e   : > { %v171_v39 = vsel %vm170_vm3, %v165_v37, 0.0  ;;  %v162_v40 = vsel %vm161_vm2, 0.0, %v156_v38  ;;  %v311_v12 = vpop.permute.xlu2 %310 }
  0x9f   : > { %v175_v41 = vsub.f32 %v171_v39, %v162_v40  ;;  %v315_v21 = vsel %vm170_vm3, %v311_v12, 0.0 }
  0xa1   : > { %v179_v44 = vmul.f32 %v175_v41, %v175_v41 }
  0xa3   : > { %v181_v45 = vadd.f32 %v179_v44, %v177_v42 }
  0xa5   : > { %v183_v46 = vadd.f32 1e-06, %v181_v45  ;;  %v167_v47 = vpop.permute.xlu1 %166  ;;  %v158_v48 = vpop.permute.xlu0 %157 }
  0xa6   : > { %v172_v49 = vsel %vm170_vm3, %v167_v47, 0.0  ;;  %v163_v50 = vsel %vm161_vm2, 0.0, %v158_v48 }
  0xa7   : > { %516 = vrsqrt.f32 %v183_v46  ;;  %v176_v51 = vsub.f32 %v172_v49, %v163_v50  ;;  %vm192_vm4 = vcmp.eq.f32.partialorder %v183_v46, inf  ;;  %v195_v26 = vand.u32 2147483648, %v183_v46 }
  0xa8   : > { %vm194_vm5 = vcmp.eq.f32.partialorder %v183_v46, 0.0 }
  0xa9   : > { %v180_v53 = vmul.f32 %v176_v51, %v176_v51 }
  0xab   : > { %v182_v55 = vadd.f32 %v180_v53, %v178_v52 }
  0xad   : > { %v517_v56 = vpop.eup %516  ;;  %v239_v59 = vpop.permute.xlu1 %238  ;;  %v748_v62 = vadd.f32 1e-06, %v182_v55 }
  0xae   : > { %v237_v60 = vpop.permute.xlu0 %236  ;;  %v186_v61 = vmul.f32 %v517_v56, %v183_v46  ;;  %v243_v63 = vsel %vm170_vm3, %v239_v59, 0.0 }
  0xaf   : > { %v242_v0 = vsel %vm170_vm3, %v237_v60, 0.0  ;;  %v247_v2 = vsub.f32 %v243_v63, %v235_v58  ;;  %518 = vrsqrt.f32 %v748_v62  ;;  %vm204_vm6 = vcmp.eq.f32.partialorder %v748_v62, inf }
  0xb0   : > { %v246_v4 = vsub.f32 %v242_v0, %v234_v57  ;;  %v187_v5 = vmul.f32 %v517_v56, %v186_v61  ;;  %v207_v49 = vand.u32 2147483648, %v748_v62  ;;  %vm206_vm7 = vcmp.eq.f32.partialorder %v748_v62, 0.0 }
  0xb1   : > { %v251_v6 = vmul.f32 %v247_v2, %v247_v2 }
  0xb2   : > { %v250_v7 = vmul.f32 %v246_v4, %v246_v4  ;;  %v188_v8 = vmul.f32 0.5, %v187_v5 }
  0xb3   : > { %v253_v9 = vadd.f32 %v251_v6, %v249_v1 }
  0xb4   : > { %v252_v10 = vadd.f32 %v250_v7, %v248_v3  ;;  %v189_v11 = vsub.f32 1.5, %v188_v8 }
  0xb5   : > { %v753_v13 = vadd.f32 1e-06, %v253_v9  ;;  %v309_v15 = vpop.permute.xlu1 %308  ;;  %v519_v17 = vpop.eup %518 }
  0xb6   : > { %v755_v14 = vadd.f32 1e-06, %v252_v10  ;;  %v303_v16 = vpop.permute.xlu0 %302  ;;  %v190_v18 = vmul.f32 %v517_v56, %v189_v11  ;;  %v314_v19 = vsel %vm170_vm3, %v309_v15, 0.0  ;;  %v198_v20 = vmul.f32 %v519_v17, %v748_v62 }
  0xb7   : > { %520 = vrsqrt.f32 %v753_v13  ;;  %v307_v22 = vsel %vm161_vm2, 0.0, %v303_v16  ;;  %v318_v28 = vsub.f32 %v314_v19, %v306_v24  ;;  %vm275_vm8 = vcmp.eq.f32.partialorder %v753_v13, inf }
  0xb8   : > { %v191_v23 = vmul.f32 %v190_v18, %v183_v46  ;;  %522 = vrsqrt.f32 %v755_v14  ;;  %v199_v27 = vmul.f32 %v519_v17, %v198_v20  ;;  %v319_v31 = vsub.f32 %v315_v21, %v307_v22 }
  0xb9   : > { %v322_v35 = vmul.f32 %v318_v28, %v318_v28  ;;  %vm277_vm9 = vcmp.eq.f32.partialorder %v753_v13, 0.0  ;;  %vm263_vm10 = vcmp.eq.f32.partialorder %v755_v14, inf  ;;  %v266_v2 = vand.u32 2147483648, %v755_v14 }
  0xba   : > { %v193_v29 = vsel %vm192_vm4, %v183_v46, %v191_v23  ;;  %v200_v34 = vmul.f32 0.5, %v199_v27  ;;  %v323_v37 = vmul.f32 %v319_v31, %v319_v31  ;;  %vm265_vm11 = vcmp.eq.f32.partialorder %v755_v14, 0.0 }
  0xbb   : > { %v196_v32 = vsel %vm194_vm5, %v195_v26, %v193_v29  ;;  %v324_v39 = vadd.f32 %v322_v35, %v320_v25 }
  0xbc   : > { %209 = vst [vmem:[%s768_s16] sm:$0xff] %v196_v32  ;;  %v201_v38 = vsub.f32 1.5, %v200_v34  ;;  %v325_v42 = vadd.f32 %v323_v37, %v321_v30 }
  0xbd   : > { %v521_v33 = vpop.eup %520  ;;  %v326_v44 = vadd.f32 1e-06, %v324_v39 }
  0xbe   : > { %v523_v40 = vpop.eup %522  ;;  %v269_v41 = vmul.f32 %v521_v33, %v753_v13  ;;  %v202_v43 = vmul.f32 %v519_v17, %v201_v38  ;;  %v773_v46 = vadd.f32 1e-06, %v325_v42 }
  0xbf   : > { %v257_v36 = vmul.f32 %v523_v40, %v755_v14  ;;  %524 = vrsqrt.f32 %v326_v44  ;;  %vm335_vm12 = vcmp.eq.f32.partialorder %v326_v44, inf  ;;  %vm337_vm13 = vcmp.eq.f32.partialorder %v326_v44, 0.0 }
  0xc0   : > { %v270_v45 = vmul.f32 %v521_v33, %v269_v41  ;;  %v203_v47 = vmul.f32 %v202_v43, %v748_v62  ;;  %526 = vrsqrt.f32 %v773_v46  ;;  %vm347_vm14 = vcmp.eq.f32.partialorder %v773_v46, inf }
  0xc1   : > { %v258_v48 = vmul.f32 %v523_v40, %v257_v36  ;;  %v350_v18 = vand.u32 2147483648, %v773_v46  ;;  %vm349_vm15 = vcmp.eq.f32.partialorder %v773_v46, 0.0 }
  0xc2   : > { %v271_v50 = vmul.f32 0.5, %v270_v45  ;;  %v205_v51 = vsel %vm204_vm6, %v748_v62, %v203_v47  ;;  %v278_v62 = vand.u32 2147483648, %v753_v13 }
  0xc3   : > { %v259_v52 = vmul.f32 0.5, %v258_v48  ;;  %v208_v53 = vsel %vm206_vm7, %v207_v49, %v205_v51 }
  0xc4   : > { %v272_v54 = vsub.f32 1.5, %v271_v50  ;;  %210 = vst [vmem:[%s768_s16 + $0x8] sm:$0xff] %v208_v53 }
  0xc5   : > { %v260_v55 = vsub.f32 1.5, %v259_v52  ;;  %v525_v57 = vpop.eup %524 }
  0xc6   : > { %v273_v56 = vmul.f32 %v521_v33, %v272_v54  ;;  %v527_v59 = vpop.eup %526  ;;  %v329_v61 = vmul.f32 %v525_v57, %v326_v44 }
  0xc7   : > { %v261_v58 = vmul.f32 %v523_v40, %v260_v55  ;;  %v341_v0 = vmul.f32 %v527_v59, %v773_v46 }
  0xc8   : > { %v274_v60 = vmul.f32 %v273_v56, %v753_v13  ;;  %v330_v3 = vmul.f32 %v525_v57, %v329_v61 }
  0xc9   : > { %v262_v63 = vmul.f32 %v261_v58, %v755_v14  ;;  %v342_v6 = vmul.f32 %v527_v59, %v341_v0 }
  0xca   : > { %v276_v1 = vsel %vm275_vm8, %v753_v13, %v274_v60  ;;  %v331_v8 = vmul.f32 0.5, %v330_v3 }
  0xcb   : > { %v279_v4 = vsel %vm277_vm9, %v278_v62, %v276_v1  ;;  %v264_v5 = vsel %vm263_vm10, %v755_v14, %v262_v63  ;;  %v343_v9 = vmul.f32 0.5, %v342_v6  ;;  %v338_v14 = vand.u32 2147483648, %v326_v44 }
  0xcc   : > { %452 = vst [vmem:[%s768_s16 + $0x18] sm:$0xff] %v279_v4  ;;  %v267_v7 = vsel %vm265_vm11, %v266_v2, %v264_v5  ;;  %v332_v10 = vsub.f32 1.5, %v331_v8 }
  0xcd   : > { %451 = vst [vmem:[%s768_s16 + $0x10] sm:$0xff] %v267_v7  ;;  %v344_v11 = vsub.f32 1.5, %v343_v9 }
  0xce   : > { %v333_v12 = vmul.f32 %v525_v57, %v332_v10 }
  0xcf   : > { %v345_v13 = vmul.f32 %v527_v59, %v344_v11 }
  0xd0   : > { %v334_v15 = vmul.f32 %v333_v12, %v326_v44 }
  0xd1   : > { %v346_v16 = vmul.f32 %v345_v13, %v773_v46 }
  0xd2   : > { %v336_v17 = vsel %vm335_vm12, %v326_v44, %v334_v15 }
  0xd3   : > { %v339_v19 = vsel %vm337_vm13, %v338_v14, %v336_v17  ;;  %v348_v20 = vsel %vm347_vm14, %v773_v46, %v346_v16 }
  0xd4   : > { %455 = vst [vmem:[%s768_s16 + $0x20] sm:$0xff] %v339_v19  ;;  %v351_v21 = vsel %vm349_vm15, %v350_v18, %v348_v20 }
  0xd5   : > { %456 = vst [vmem:[%s768_s16 + $0x28] sm:$0xff] %v351_v21 }
  0xd6   : > { %585 = shalt.err (!%p582_p7)
}
  0xd7   : > { %s630_s20 = smov 128   ;;  %s631_s21 = smov 8  }
  0xd8   : > { %466 = dma.vmem_to_hbm [thread:$0]  (%p688_p11), %s369_s10, 768, %s371_s30, %s356_s2, %s630_s20, %s630_s20, %s631_s21  }
  0xd9 PF: > { %s385_s22 = sand.u32 1, %s612_s6   ;;  %p473_p8 = pnand %p446_p9, %p692_p12 }
  0xda   : > { %s386_s23 = scalar_lea.sflag [#allocation4], %s385_s22 }
  0xdb   : > { %p474_p10 = pneg %p473_p8 }
  0xdd   : > { %607 = dma.done.wait (%p474_p10), %s386_s23, 768  }
  0xde   : > { %609 = vsyncadd (%p474_p10), %s386_s23, 4294966528  ;;  %p14_p0 = scmp.ge.s32.totalorder %s667_s12, 4   ;;  %s842_s6 = smov %s616_s7 }
  0xdf   : > { %s843_s7 = smov %s620_s8  ;;  %s844_s8 = smov %s679_s15 }
  0xe0   : > { %s845_s9 = smov %s667_s12  ;;  %16 = sbr.rel (!%p14_p0) target bundleno = 5 (0x5), region = 73 }
  0xe5   :  { %392 = vsyncpa [#allocation3], 1 }
  0xe6   :  { %394 = vsyncpa [#allocation3 + $0x1], 1 }
  0xe7   :  { %395 = vsyncpa [#allocation4], 1 }
  0xe8   :  { %397 = vsyncpa [#allocation4 + $0x1], 1 }

</bundles_post_ra>
